<compile_context>
chip_gen: v5e
topology: v5e:2x2
jax: 0.10.0
libtpu: 0.0.40
codegen_flags: <defaults>
</compile_context>

<pallas_src>
import functools

import jax
import jax.numpy as jnp
from jax.experimental import pallas as pl
from jax.experimental.pallas import tpu as pltpu


def _lineconv_kernel(m_ref, xsum_ref, out_ref):
    # m_ref:    [B, B]   propagation polynomial (I + DA + ... + DA^L) with the
    #                    1/session_len mean-pool normalization folded into its
    #                    columns (f32, resident across the whole grid)
    # xsum_ref: [B, tE]  un-normalized per-session embedding sums (lane tile)
    # out_ref:  [B, tE]  summed multi-layer session embedding tile
    out_ref[...] = jnp.dot(
        m_ref[...], xsum_ref[...],
        preferred_element_type=jnp.float32).astype(out_ref.dtype)


def line_conv(item_embedding, D, A, session_item, session_len, *,
              layers, lane_tile=2048):
    """JAX wrapper matching LineConv.forward.

    item_embedding: [n_items, E] float
    D, A:           [B, B]       float
    session_item:   [B, S]       int32 indices (0 == padding row)
    session_len:    [B, 1]       float
    """
    f32 = jnp.float32
    emb_size = item_embedding.shape[-1]
    B = session_item.shape[0]

    # ---------------- glue (XLA): gather, sum-pool, propagation matrix -------
    padded = jnp.concatenate(
        [jnp.zeros((1, emb_size), dtype=item_embedding.dtype), item_embedding],
        axis=0)
    x_sum = jnp.sum(padded[session_item].astype(f32), axis=1)        # [B, E]

    da = jnp.dot(D.astype(f32), A.astype(f32))                       # [B, B]
    m = jnp.eye(B, dtype=f32)
    p = jnp.eye(B, dtype=f32)
    for _ in range(layers):                  # layers is a compile-time int
        p = p @ da
        m = m + p                            # M = I + DA + DA^2 + ... + DA^L
    # Fold the mean-pool normalization into M's columns (tiny [B,B] work, so
    # the "don't pre-scale streamed inputs" anti-pattern does not apply):
    #   M' @ x_sum == M @ diag(1/len) @ x_sum == M @ (x_sum / len)
    m = m / session_len.astype(f32).reshape(1, B)                    # [B, B]

    # ---------------- lane-tile selection ------------------------------------
    # Small E: one full-extent block — no lane padding, no un-pad slice copy,
    # stores hit the exact output width.  Large E: pad E UP to a multiple of a
    # big (>=2048-lane, 128-aligned) tile so every grid step is a long,
    # lane-dense, unmasked vst stream (never shrink the tile toward 128).
    lane_tile = max(128, ((lane_tile + 127) // 128) * 128)
    if emb_size <= lane_tile:
        t_e = emb_size
        e_pad = emb_size
    else:
        t_e = lane_tile
        e_pad = ((emb_size + t_e - 1) // t_e) * t_e
        if e_pad != emb_size:
            x_sum = jnp.pad(x_sum, ((0, 0), (0, e_pad - emb_size)))
    n_tiles = e_pad // t_e

    # ---------------- VMEM budget: actual double-buffered requirement --------
    tile_bytes = B * t_e * 4                       # f32 streamed tiles
    need = 2 * tile_bytes + 2 * tile_bytes + B * B * 4 + (2 << 20)
    vmem_budget = int(min(48 << 20, max(4 << 20, need)))

    # NOTE: x_sum / out could be streamed as bfloat16 (f32 MXU accumulation)
    # for ~2x on v6e/v7x, but that would blow the 1e-4 accuracy budget here.
    out = pl.pallas_call(
        _lineconv_kernel,
        out_shape=jax.ShapeDtypeStruct((B, e_pad), f32),
        grid=(n_tiles,),
        in_specs=[
            pl.BlockSpec((B, B), lambda i: (0, 0)),    # M': resident, E-indep.
            pl.BlockSpec((B, t_e), lambda i: (0, i)),  # pooled sums, lane tile
        ],
        out_specs=pl.BlockSpec((B, t_e), lambda i: (0, i)),
        compiler_params=pltpu.CompilerParams(
            dimension_semantics=("parallel",),         # v7x: tiles split on 2 TCs
            vmem_limit_bytes=vmem_budget),
        cost_estimate=pl.CostEstimate(
            flops=2 * B * B * e_pad,
            transcendentals=0,
            bytes_accessed=(2 * B * e_pad + B * B) * 4),
    )(m, x_sum)

    if e_pad == emb_size:
        return out
    # TODO(synk): for large ragged E, push this un-pad into the downstream
    #             consumer (or keep the padded width) to avoid a full
    #             read+rewrite of the [B, E] output.
    return out[:, :emb_size]


def _reference(item_embedding, D, A, session_item, session_len, *, layers):
    # Direct transcription of LineConv.forward.
    emb_size = item_embedding.shape[-1]
    padded = jnp.concatenate(
        [jnp.zeros((1, emb_size), dtype=item_embedding.dtype), item_embedding],
        axis=0)
    seq_h = padded[session_item]
    x = jnp.sum(seq_h, axis=1) / session_len
    da = D @ A
    acc = x
    for _ in range(layers):
        x = da @ x
        acc = acc + x
    return acc


if __name__ == "__main__":
    key = jax.random.PRNGKey(0)
    k_emb, k_d, k_a, k_items, k_len = jax.random.split(key, 5)

    n_items = 20       # number of real items (index 0 reserved for padding)
    emb_size = 200     # not a multiple of 128 -> exercises full-extent block
    batch = 8
    seq_len = 8
    layers = 3

    item_embedding = jax.random.normal(k_emb, (n_items, emb_size), jnp.float32)
    D = jax.random.normal(k_d, (batch, batch), jnp.float32) * 0.1
    A = jax.random.normal(k_a, (batch, batch), jnp.float32) * 0.1
    # item indices in [0, n_items]; 0 == padding (zero row)
    session_item = jax.random.randint(k_items, (batch, seq_len), 0, n_items + 1,
                                      dtype=jnp.int32)
    session_len = jax.random.randint(k_len, (batch, 1), 1, seq_len + 1
                                     ).astype(jnp.float32)

    run = functools.partial(line_conv, layers=layers)
    out = jax.block_until_ready(run(item_embedding, D, A, session_item,
                                    session_len))

    ref = _reference(item_embedding, D, A, session_item, session_len,
                     layers=layers)
    assert out.shape == (batch, emb_size)
    assert jnp.allclose(out, ref, atol=1e-4, rtol=1e-4)

    print("KERNEL_OK")
</pallas_src>

<mosaic_0001>
module attributes {stable_mosaic.version = 11 : i64} {
  func.func @_lineconv_kernel(%arg0: i32, %arg1: memref<8x8xf32, #tpu.memory_space<vmem>>, %arg2: memref<8x200xf32, #tpu.memory_space<vmem>>, %arg3: memref<8x200xf32, #tpu.memory_space<vmem>>) attributes {dimension_semantics = [#tpu.dimension_semantics<parallel>], iteration_bounds = array<i64: 1>, scalar_prefetch = 0 : i64, scratch_operands = 0 : i64, tpu.core_type = #tpu.core_type<tc>, window_params = [{pipeline_mode = #tpu.pipeline_mode<synchronous>, transform_indices = @transform_0, window_bounds = array<i64: 8, 8>}, {transform_indices = @transform_1, window_bounds = array<i64: 8, 200>}, {transform_indices = @transform_2, window_bounds = array<i64: 8, 200>}]} {
    %c0 = arith.constant 0 : index
    %c0_0 = arith.constant 0 : index
    %0 = vector.load %arg1[%c0, %c0_0] : memref<8x8xf32, #tpu.memory_space<vmem>>, vector<8x8xf32>
    %c0_1 = arith.constant 0 : index
    %c0_2 = arith.constant 0 : index
    %1 = vector.load %arg2[%c0_1, %c0_2] : memref<8x200xf32, #tpu.memory_space<vmem>>, vector<8x200xf32>
    %cst = arith.constant dense<0.000000e+00> : vector<8x200xf32>
    %2 = tpu.matmul %0, %1, %cst {dimension_numbers = #tpu.dot_dimension_numbers<[1], [0], [0], [1], [0, 0, 1, 1], [], []>} : vector<8x8xf32>, vector<8x200xf32>, vector<8x200xf32> -> vector<8x200xf32>
    %c0_3 = arith.constant 0 : index
    %c0_4 = arith.constant 0 : index
    %3 = vector.load %arg3[%c0_3, %c0_4] : memref<8x200xf32, #tpu.memory_space<vmem>>, vector<8x200xf32>
    tpu.vector_store %arg3[%c0_3, %c0_4], %2 {strides = array<i32>} : memref<8x200xf32, #tpu.memory_space<vmem>>, vector<8x200xf32>,
    return
  }
  func.func @transform_0(%arg0: i32) -> (i32, i32) {
    %c0_i32 = arith.constant 0 : i32
    %c0_i32_0 = arith.constant 0 : i32
    %c0_i32_1 = arith.constant 0 : i32
    return %c0_i32, %c0_i32_0 : i32, i32
  }
  func.func @transform_1(%arg0: i32) -> (i32, i32) {
    %c0_i32 = arith.constant 0 : i32
    %c0_i32_0 = arith.constant 0 : i32
    return %c0_i32, %arg0 : i32, i32
  }
  func.func @transform_2(%arg0: i32) -> (i32, i32) {
    %c0_i32 = arith.constant 0 : i32
    %c0_i32_0 = arith.constant 0 : i32
    return %c0_i32, %arg0 : i32, i32
  }
}

</mosaic_0001>

<bundles_post_ra>
// kernel: tpu_custom_call.1
= control target key start
LH: loop header
LB: loop body
LE: loop exit
PB: predicated region body
PF: predicated region fallthrough
CT: control target
= control target key end

     0   :  { %7 = vsyncpa [#allocation3], 0  ;;  %s218_s0 = inlined_call_operand.hbm [shape: f32[8,8], index: 0, kind: input, shape index: {}]   ;;  %s219_s1 = inlined_call_operand.hbm [shape: f32[8,200], index: 1, kind: input, shape index: {}]   ;;  %s220_s2 = inlined_call_operand.hbm [shape: f32[8,200], index: 2, kind: output, shape index: {}]  }
   0x1   :  { %8 = vsyncpa [#allocation6], 0 }
   0x2   :  { %9 = vsyncpa [#allocation4], 0  ;;  %s15_s11 = sshll.u32 %s218_s0, 4  ;;  %s191_s12 = smov [#allocation2]   ;;  %s16_s11 = int_to_ptr.hbm [resolvable:$true] %s15_s11 }
   0x3   :  { %s17_s13 = sshll.u32 %s191_s12, 4  ;;  %s26_s16 = sshll.u32 %s219_s1, 4  ;;  %s18_s13 = int_to_ptr.vmem [resolvable:$true] %s17_s13  ;;  %s27_s16 = int_to_ptr.hbm [resolvable:$true] %s26_s16 }
   0x4   :  { %20 = dma.hbm_to_vmem [thread:$0]  %s16_s11, 128, %s18_s13, [#allocation3]  }
   0x5   :  { %s192_s17 = smov [#allocation5]  }
   0x6   :  { %s28_s18 = sshll.u32 %s192_s17, 4  ;;  %s29_s18 = int_to_ptr.vmem [resolvable:$true] %s28_s18 }
   0x7   :  { %31 = dma.hbm_to_vmem [thread:$0]  %s27_s16, 256, %s29_s18, [#allocation6]  }
   0x8   :  { %185 = dma.done.wait [#allocation3], 128  }
   0x9   :  { %186 = vsyncadd [#allocation3], 4294967168 }
   0xa   :  { %187 = dma.done.wait [#allocation6], 256  }
   0xb   :  { %188 = vsyncadd [#allocation6], 4294967040  ;;  %vm43_vm0 = vcmask 64512   ;;  %v41_v0 = vld [vmem:[#allocation5] sm:$0xff]  ;;  %v42_v1 = vld [vmem:[#allocation5 + $0x8] sm:$0xff]  ;;  %s193_s0 = smov [#allocation7]  }
   0xc   :  { %v40_v2 = vld [vmem:[#allocation2] sm:$0xff]  ;;  %62 = vmatpush.msra.mxu0 %v41_v0  ;;  %82 = vmatpush.msra.mxu1 %v42_v1  ;;  %s95_s1 = sshll.u32 %s193_s0, 4  ;;  %s97_s21 = sshll.u32 %s220_s2, 4  ;;  %vm88_vm1 = vcmask 588800   ;;  %s96_s1 = int_to_ptr.vmem [resolvable:$true] %s95_s1  ;;  %s98_s21 = int_to_ptr.hbm [resolvable:$true] %s97_s21 }
   0xd   :  { %108 = vmatmul.msk.f32.vlgmr.msra.gmra.mxu0 %vm43_vm0, %v40_v2  ;;  %109 = vmatmul.msk.f32.vlgmr.msra.gmra.mxu1 %vm43_vm0, %v40_v2 }
  0x8a   :  { %v64_v3 = vpop.f32.mrf.mxu0  ;;  %v84_v4 = vpop.f32.mrf.mxu1 }
  0x8b   :  { %87 = vst [vmem:[#allocation7] sm:$0xff] %v64_v3 }
  0x8c   :  { %89 = vst.msk [vmem:[#allocation7 + $0x8] sm:$0xff] %vm88_vm1, %v84_v4 }
  0x8d   :  { %100 = dma.vmem_to_hbm [thread:$0]  %s96_s1, 256, %s98_s21, [#allocation4]  }
  0x8e   :  { %189 = dma.done.wait [#allocation4], 256  }
  0x8f   :  { %190 = vsyncadd [#allocation4], 4294967040 }
  0x90   :  { %105 = vsyncpa [#allocation3], 1 }
  0x91   :  { %106 = vsyncpa [#allocation6], 1 }
  0x92   :  { %107 = vsyncpa [#allocation4], 1 }

</bundles_post_ra>
